<compile_context>
chip_gen: v7x
topology: tpu7x:2x2x1
jax: 0.10.0
libtpu: 0.0.40
codegen_flags: <defaults>
</compile_context>

<pallas_src>
import functools

import jax
import jax.numpy as jnp
from jax import lax
from jax.experimental import pallas as pl
from jax.experimental.pallas import tpu as pltpu


def _rrrb_kernel(x_ref, g_ref, bout_ref, mask_ref, o_ref, *, W, HWp):
    """One batch element.

    x_ref/o_ref: (C, HWp)  channels on sublanes, flattened HW on lanes.
    g_ref:       (C, 9*C)  folded taps, columns ordered (tap k, in-channel c).
    bout_ref:    (C, 1)    folded output bias.
    mask_ref:    (9, HWp)  0/1 in-image masks per tap (precomputed in wrapper).
    """
    x = x_ref[...].astype(jnp.float32)             # (C, HWp)
    masks = mask_ref[...]                          # (9, HWp)

    # Build the 9 shifted/masked taps and stack them along the contraction
    # axis so the whole 3x3 conv becomes ONE wide-K MXU matmul.
    taps = []
    for ky in range(3):
        for kx in range(3):
            k = ky * 3 + kx
            off = (ky - 1) * W + (kx - 1)
            t = x if off == 0 else pltpu.roll(x, shift=(-off) % HWp, axis=1)
            if k != 4:                             # center-tap mask is all ones
                t = t * masks[k:k + 1, :]
            taps.append(t)
    stack = jnp.concatenate(taps, axis=0)          # (9*C, HWp)

    out = jnp.dot(g_ref[...], stack,
                  preferred_element_type=jnp.float32,
                  precision=lax.Precision.HIGHEST)
    o_ref[...] = (out + bout_ref[...]).astype(o_ref.dtype)


def rrrb_forward(x, w_exp, b_exp, w_fea, b_fea, w_red, b_red):
    """x: (B, C, H, W). PyTorch Conv2d weight layouts:
       w_exp: (E, C, 1, 1), b_exp: (E,)
       w_fea: (E, E, 3, 3), b_fea: (E,)
       w_red: (C, E, 1, 1), b_red: (C,)."""
    B, C, H, W = x.shape
    E = w_exp.shape[0]
    HW = H * W
    HWp = ((HW + 127) // 128) * 128                # lane-dense output width

    hi = lax.Precision.HIGHEST
    wexp = w_exp.reshape(E, C).astype(jnp.float32)
    wred = w_red.reshape(C, E).astype(jnp.float32)
    wf = jnp.transpose(w_fea, (2, 3, 0, 1)).reshape(9, E, E).astype(jnp.float32)

    # ---- fold the whole block into 9 CxC taps + one bias (exact re-param) ---
    #   mid = sum_k m_k * Wf_k (W_exp x_k) + (sum_k Wf_k) b0 + b_fea + W_exp x + b0
    #   out = W_red mid + b_red + x
    wf_c = wf.at[4].add(jnp.eye(E, dtype=jnp.float32))         # identity skip
    A = jnp.einsum("kef,fc->kec", wf_c, wexp, precision=hi)    # (9, E, C)
    G = jnp.einsum("oe,kec->koc", wred, A, precision=hi)       # (9, C, C)
    G = G.at[4].add(jnp.eye(C, dtype=jnp.float32))             # outer residual
    g_cat = jnp.transpose(G, (1, 0, 2)).reshape(C, 9 * C)      # (C, 9C)

    # b0 reaches every tap (constant-b0 border fold) plus once via the skip.
    bmid = jnp.einsum("kef,f->e", wf_c, b_exp, precision=hi) + b_fea
    b_out = jnp.einsum("oe,e->o", wred, bmid, precision=hi) + b_red
    b_out = b_out.reshape(C, 1).astype(jnp.float32)

    # ---- precomputed boundary masks: lane position -> 0/1 per tap -----------
    p = jnp.arange(HWp)
    row, col = p // W, p % W
    in_img = p < HW
    masks = []
    for ky in range(3):
        for kx in range(3):
            oy, ox = ky - 1, kx - 1
            m = (row + oy >= 0) & (row + oy < H) & \
                (col + ox >= 0) & (col + ox < W) & in_img
            masks.append(m)
    masks = jnp.stack(masks).astype(jnp.float32)               # (9, HWp)

    x3 = x.reshape(B, C, HW)
    if HWp != HW:
        x3 = jnp.pad(x3, ((0, 0), (0, 0), (0, HWp - HW)))

    kernel = functools.partial(_rrrb_kernel, W=W, HWp=HWp)
    out = pl.pallas_call(
        kernel,
        out_shape=jax.ShapeDtypeStruct((B, C, HWp), x.dtype),
        grid_spec=pltpu.PrefetchScalarGridSpec(
            num_scalar_prefetch=0,
            grid=(B,),
            in_specs=[
                pl.BlockSpec((None, C, HWp), lambda b: (b, 0, 0)),  # x
                pl.BlockSpec((C, 9 * C), lambda b: (0, 0)),         # folded taps
                pl.BlockSpec((C, 1), lambda b: (0, 0)),             # folded bias
                pl.BlockSpec((9, HWp), lambda b: (0, 0)),           # masks
            ],
            out_specs=pl.BlockSpec((None, C, HWp), lambda b: (b, 0, 0)),
        ),
        compiler_params=pltpu.CompilerParams(
            dimension_semantics=("parallel",)),
    )(x3, g_cat, b_out, masks)

    return out[:, :, :HW].reshape(B, C, H, W)


# ----------------------------- pure-JAX reference -----------------------------

def _pad_tensor_ref(t, pattern):
    pattern = pattern.reshape(1, -1, 1, 1)
    t = jnp.pad(t, ((0, 0), (0, 0), (1, 1), (1, 1)))
    t = t.at[:, :, 0:1, :].set(pattern)
    t = t.at[:, :, -1:, :].set(pattern)
    t = t.at[:, :, :, 0:1].set(pattern)
    t = t.at[:, :, :, -1:].set(pattern)
    return t


def rrrb_reference(x, w_exp, b_exp, w_fea, b_fea, w_red, b_red):
    E, C = w_exp.shape[0], w_exp.shape[1]
    out = jnp.einsum("oc,bchw->bohw", w_exp.reshape(E, C), x) \
        + b_exp[None, :, None, None]
    out_identity = out
    out = _pad_tensor_ref(out, b_exp)
    out = lax.conv_general_dilated(
        out, w_fea, window_strides=(1, 1), padding="VALID",
        dimension_numbers=("NCHW", "OIHW", "NCHW"))
    out = out + b_fea[None, :, None, None] + out_identity
    out = jnp.einsum("oc,bchw->bohw", w_red.reshape(C, E), out) \
        + b_red[None, :, None, None]
    return out + x


if __name__ == "__main__":
    # Keep both the XLA reference and the in-kernel MXU dots at f32 accuracy.
    jax.config.update("jax_default_matmul_precision", "highest")

    B, n_feats, H, W = 2, 16, 16, 16
    ratio = 2
    C, E = n_feats, ratio * n_feats

    key = jax.random.PRNGKey(0)
    kx, k1, kb1, k2, kb2, k3, kb3 = jax.random.split(key, 7)

    x = jax.random.normal(kx, (B, C, H, W), dtype=jnp.float32)
    w_exp = jax.random.normal(k1, (E, C, 1, 1), dtype=jnp.float32) * 0.1
    b_exp = jax.random.normal(kb1, (E,), dtype=jnp.float32) * 0.1
    w_fea = jax.random.normal(k2, (E, E, 3, 3), dtype=jnp.float32) * 0.05
    b_fea = jax.random.normal(kb2, (E,), dtype=jnp.float32) * 0.1
    w_red = jax.random.normal(k3, (C, E, 1, 1), dtype=jnp.float32) * 0.1
    b_red = jax.random.normal(kb3, (C,), dtype=jnp.float32) * 0.1

    out = rrrb_forward(x, w_exp, b_exp, w_fea, b_fea, w_red, b_red)
    jax.block_until_ready(out)

    ref = rrrb_reference(x, w_exp, b_exp, w_fea, b_fea, w_red, b_red)
    assert out.shape == (B, C, H, W)
    assert jnp.allclose(out, ref, rtol=1e-3, atol=1e-3), \
        float(jnp.max(jnp.abs(out - ref)))

    print("KERNEL_OK")
</pallas_src>

<mosaic_0001>
module attributes {stable_mosaic.version = 11 : i64} {
  func.func @_rrrb_kernel(%arg0: i32, %arg1: memref<1x16x256xf32, #tpu.memory_space<vmem>>, %arg2: memref<16x144xf32, #tpu.memory_space<vmem>>, %arg3: memref<16x1xf32, #tpu.memory_space<vmem>>, %arg4: memref<9x256xf32, #tpu.memory_space<vmem>>, %arg5: memref<1x16x256xf32, #tpu.memory_space<vmem>>) attributes {dimension_semantics = [#tpu.dimension_semantics<parallel>], iteration_bounds = array<i64: 2>, scalar_prefetch = 0 : i64, scratch_operands = 0 : i64, tpu.core_type = #tpu.core_type<tc>, window_params = [{transform_indices = @transform_0, window_bounds = array<i64: 1, 16, 256>}, {pipeline_mode = #tpu.pipeline_mode<synchronous>, transform_indices = @transform_1, window_bounds = array<i64: 16, 144>}, {pipeline_mode = #tpu.pipeline_mode<synchronous>, transform_indices = @transform_2, window_bounds = array<i64: 16, 1>}, {pipeline_mode = #tpu.pipeline_mode<synchronous>, transform_indices = @transform_3, window_bounds = array<i64: 9, 256>}, {transform_indices = @transform_4, window_bounds = array<i64: 1, 16, 256>}]} {
    %c0 = arith.constant 0 : index
    %c0_0 = arith.constant 0 : index
    %c0_1 = arith.constant 0 : index
    %0 = vector.load %arg1[%c0, %c0_0, %c0_1] : memref<1x16x256xf32, #tpu.memory_space<vmem>>, vector<1x16x256xf32>
    %1 = vector.shape_cast %0 : vector<1x16x256xf32> to vector<16x256xf32>
    %c0_2 = arith.constant 0 : index
    %c0_3 = arith.constant 0 : index
    %2 = vector.load %arg4[%c0_2, %c0_3] : memref<9x256xf32, #tpu.memory_space<vmem>>, vector<9x256xf32>
    %c17_i32 = arith.constant 17 : i32
    %3 = tpu.dynamic_rotate %1 by %c17_i32 dim 1 : vector<16x256xf32>, i32 -> vector<16x256xf32>
    %4 = vector.extract_strided_slice %2 {offsets = [0, 0], sizes = [1, 256], strides = [1, 1]} : vector<9x256xf32> to vector<1x256xf32>
    %5 = vector.broadcast %4 : vector<1x256xf32> to vector<16x256xf32>
    %6 = arith.mulf %3, %5 : vector<16x256xf32>
    %c16_i32 = arith.constant 16 : i32
    %7 = tpu.dynamic_rotate %1 by %c16_i32 dim 1 : vector<16x256xf32>, i32 -> vector<16x256xf32>
    %8 = vector.extract_strided_slice %2 {offsets = [1, 0], sizes = [1, 256], strides = [1, 1]} : vector<9x256xf32> to vector<1x256xf32>
    %9 = vector.broadcast %8 : vector<1x256xf32> to vector<16x256xf32>
    %10 = arith.mulf %7, %9 : vector<16x256xf32>
    %c15_i32 = arith.constant 15 : i32
    %11 = tpu.dynamic_rotate %1 by %c15_i32 dim 1 : vector<16x256xf32>, i32 -> vector<16x256xf32>
    %12 = vector.extract_strided_slice %2 {offsets = [2, 0], sizes = [1, 256], strides = [1, 1]} : vector<9x256xf32> to vector<1x256xf32>
    %13 = vector.broadcast %12 : vector<1x256xf32> to vector<16x256xf32>
    %14 = arith.mulf %11, %13 : vector<16x256xf32>
    %c1_i32 = arith.constant 1 : i32
    %15 = tpu.dynamic_rotate %1 by %c1_i32 dim 1 : vector<16x256xf32>, i32 -> vector<16x256xf32>
    %16 = vector.extract_strided_slice %2 {offsets = [3, 0], sizes = [1, 256], strides = [1, 1]} : vector<9x256xf32> to vector<1x256xf32>
    %17 = vector.broadcast %16 : vector<1x256xf32> to vector<16x256xf32>
    %18 = arith.mulf %15, %17 : vector<16x256xf32>
    %c255_i32 = arith.constant 255 : i32
    %19 = tpu.dynamic_rotate %1 by %c255_i32 dim 1 : vector<16x256xf32>, i32 -> vector<16x256xf32>
    %20 = vector.extract_strided_slice %2 {offsets = [5, 0], sizes = [1, 256], strides = [1, 1]} : vector<9x256xf32> to vector<1x256xf32>
    %21 = vector.broadcast %20 : vector<1x256xf32> to vector<16x256xf32>
    %22 = arith.mulf %19, %21 : vector<16x256xf32>
    %c241_i32 = arith.constant 241 : i32
    %23 = tpu.dynamic_rotate %1 by %c241_i32 dim 1 : vector<16x256xf32>, i32 -> vector<16x256xf32>
    %24 = vector.extract_strided_slice %2 {offsets = [6, 0], sizes = [1, 256], strides = [1, 1]} : vector<9x256xf32> to vector<1x256xf32>
    %25 = vector.broadcast %24 : vector<1x256xf32> to vector<16x256xf32>
    %26 = arith.mulf %23, %25 : vector<16x256xf32>
    %c240_i32 = arith.constant 240 : i32
    %27 = tpu.dynamic_rotate %1 by %c240_i32 dim 1 : vector<16x256xf32>, i32 -> vector<16x256xf32>
    %28 = vector.extract_strided_slice %2 {offsets = [7, 0], sizes = [1, 256], strides = [1, 1]} : vector<9x256xf32> to vector<1x256xf32>
    %29 = vector.broadcast %28 : vector<1x256xf32> to vector<16x256xf32>
    %30 = arith.mulf %27, %29 : vector<16x256xf32>
    %c239_i32 = arith.constant 239 : i32
    %31 = tpu.dynamic_rotate %1 by %c239_i32 dim 1 : vector<16x256xf32>, i32 -> vector<16x256xf32>
    %32 = vector.extract_strided_slice %2 {offsets = [8, 0], sizes = [1, 256], strides = [1, 1]} : vector<9x256xf32> to vector<1x256xf32>
    %33 = vector.broadcast %32 : vector<1x256xf32> to vector<16x256xf32>
    %34 = arith.mulf %31, %33 : vector<16x256xf32>
    %35 = tpu.concatenate %6, %10, %14, %18, %1, %22, %26, %30, %34 in 0 : vector<16x256xf32>, vector<16x256xf32>, vector<16x256xf32>, vector<16x256xf32>, vector<16x256xf32>, vector<16x256xf32>, vector<16x256xf32>, vector<16x256xf32>, vector<16x256xf32> -> vector<144x256xf32>
    %c0_4 = arith.constant 0 : index
    %c0_5 = arith.constant 0 : index
    %36 = vector.load %arg2[%c0_4, %c0_5] : memref<16x144xf32, #tpu.memory_space<vmem>>, vector<16x144xf32>
    %cst = arith.constant dense<0.000000e+00> : vector<16x256xf32>
    %37 = tpu.matmul %36, %35, %cst {dimension_numbers = #tpu.dot_dimension_numbers<[1], [0], [0], [1], [0, 0, 1, 1], [], []>, precision = #tpu.contract_precision<fp32>} : vector<16x144xf32>, vector<144x256xf32>, vector<16x256xf32> -> vector<16x256xf32>
    %c0_6 = arith.constant 0 : index
    %c0_7 = arith.constant 0 : index
    %38 = vector.load %arg3[%c0_6, %c0_7] : memref<16x1xf32, #tpu.memory_space<vmem>>, vector<16x1xf32>
    %39 = vector.broadcast %38 : vector<16x1xf32> to vector<16x256xf32>
    %40 = arith.addf %37, %39 : vector<16x256xf32>
    %c0_8 = arith.constant 0 : index
    %c0_9 = arith.constant 0 : index
    %c0_10 = arith.constant 0 : index
    %41 = vector.load %arg5[%c0_8, %c0_9, %c0_10] : memref<1x16x256xf32, #tpu.memory_space<vmem>>, vector<1x16x256xf32>
    %42 = vector.shape_cast %41 : vector<1x16x256xf32> to vector<16x256xf32>
    %43 = vector.shape_cast %40 : vector<16x256xf32> to vector<1x16x256xf32>
    tpu.vector_store %arg5[%c0_8, %c0_9, %c0_10], %43 {strides = array<i32>} : memref<1x16x256xf32, #tpu.memory_space<vmem>>, vector<1x16x256xf32>,
    return
  }
  func.func @transform_0(%arg0: i32) -> (i32, i32, i32) {
    %c0_i32 = arith.constant 0 : i32
    %c0_i32_0 = arith.constant 0 : i32
    %c0_i32_1 = arith.constant 0 : i32
    return %arg0, %c0_i32, %c0_i32_0 : i32, i32, i32
  }
  func.func @transform_1(%arg0: i32) -> (i32, i32) {
    %c0_i32 = arith.constant 0 : i32
    %c0_i32_0 = arith.constant 0 : i32
    %c0_i32_1 = arith.constant 0 : i32
    return %c0_i32, %c0_i32_0 : i32, i32
  }
  func.func @transform_2(%arg0: i32) -> (i32, i32) {
    %c0_i32 = arith.constant 0 : i32
    %c0_i32_0 = arith.constant 0 : i32
    %c0_i32_1 = arith.constant 0 : i32
    return %c0_i32, %c0_i32_0 : i32, i32
  }
  func.func @transform_3(%arg0: i32) -> (i32, i32) {
    %c0_i32 = arith.constant 0 : i32
    %c0_i32_0 = arith.constant 0 : i32
    %c0_i32_1 = arith.constant 0 : i32
    return %c0_i32, %c0_i32_0 : i32, i32
  }
  func.func @transform_4(%arg0: i32) -> (i32, i32, i32) {
    %c0_i32 = arith.constant 0 : i32
    %c0_i32_0 = arith.constant 0 : i32
    %c0_i32_1 = arith.constant 0 : i32
    return %arg0, %c0_i32, %c0_i32_0 : i32, i32, i32
  }
}

</mosaic_0001>

<bundles_post_ra>
// kernel: tpu_custom_call.1
= control target key start
LH: loop header
LB: loop body
LE: loop exit
PB: predicated region body
PF: predicated region fallthrough
CT: control target
= control target key end

     0   :  { %9 = vsyncpa [#allocation3], 0  ;;  %s3126_s0 = inlined_call_operand.hbm [shape: f32[2,16,256], index: 0, kind: input, shape index: {}]   ;;  %s3127_s1 = inlined_call_operand.hbm [shape: f32[16,144], index: 1, kind: input, shape index: {}]   ;;  %s3128_s2 = inlined_call_operand.vmem [shape: f32[16,1], index: 2, kind: input, shape index: {}]   ;;  %s3129_s3 = inlined_call_operand.hbm [shape: f32[9,256], index: 3, kind: input, shape index: {}]   ;;  %s3130_s4 = inlined_call_operand.hbm [shape: f32[2,16,256], index: 4, kind: output, shape index: {}]  }
   0x1   :  { %11 = vsyncpa [#allocation3 + $0x1], 0 }
   0x2   :  { %12 = vsyncpa [#allocation6], 0 }
   0x3   :  { %13 = vsyncpa [#allocation4], 0 }
   0x4   :  { %15 = vsyncpa [#allocation4 + $0x1], 0  ;;  %s2112_s15 = smov 0   ;;  %s2114_s16 = smov 0  }
   0x5   :  { %s2116_s17 = smov 0   ;;  %s2118_s18 = smov 0  }
   0x6 LB: > { %s2133_s19 = sadd.s32 4294967295, %s2069_s18   ;;  %s1570_s20 = sadd.s32 4294967294, %s2069_s18   ;;  %s2069_s18 = sphi %s2118_s18, %s3335_s18   ;;  %s2065_s17 = sphi %s2116_s17, %s3334_s17   ;;  %s2061_s16 = sphi %s2114_s16, %s3333_s16   ;;  %s2057_s15 = sphi %s2112_s15, %s3332_s15  }
   0x7   : > { %p41_p0 = scmp.ne.s32.totalorder %s2061_s16, %s2057_s15  ;;  %p3131_p1 = scmp.eq.s32.totalorder %s2133_s19, 0 }
   0x8   : > { %p134_p3 = scmp.eq.s32.totalorder %s1570_s20, 1  ;;  %p1571_p5 = scmp.ge.s32.totalorder %s2069_s18, 1 }
   0x9   : > { %p2142_p4 = por %p3131_p1, %p41_p0  ;;  %p141_p7 = scmp.lt.s32.totalorder %s2069_s18, 3 }
   0xa   : > { %p2147_p6 = por %p134_p3, %p41_p0  ;;  %s2071_s24 = smov [#allocation5]  }
   0xb   : > { %s3194_s21 = scalar_select %p2142_p4, 1, 0 }
   0xc   : > { %s3195_s22 = scalar_select %p2147_p6, 1, 0 }
   0xd   : > { %p2152_p8 = pnand %p1571_p5, %p141_p7  ;;  %s153_s25 = sshll.u32 %s2071_s24, 4  ;;  %s2156_s25 = int_to_ptr.vmem [resolvable:$true] %s153_s25 }
   0xe   : > { %s2072_s27 = smov [#allocation7]   ;;  %s1913_s5 = scalar_lea.hbm %s3127_s1, 512 }
   0xf   : > { %p1844_p9 = pneg %p2152_p8  ;;  %s169_s28 = sshll.u32 %s2072_s27, 4  ;;  %s2167_s28 = int_to_ptr.vmem [resolvable:$true] %s169_s28 }
  0x10   : > { %p1914_p12 = scmp.ne.s32.totalorder %s3127_s1, %s1913_s5  ;;  %p1920_p5 = scmp.lt.u32.totalorder %s1913_s5, %s3127_s1 }
  0x11   : > { %p2163_p11 = pnand %p1844_p9, %p3131_p1 }
  0x13   : > { %p1915_p13 = pneg %p2163_p11 }
  0x15   : > { %p1916_p0 = pnand %p1915_p13, %p1914_p12 }
  0x17   : > { %p1917_p3 = pneg %p1916_p0 }
  0x19   : > { %p1922_p7 = pnand %p1920_p5, %p1917_p3 }
  0x1b   : > { %1925 = shalt.err (!%p1922_p7)
}
  0x1c   : > { %s1926_s10 = scalar_lea.vmem %s2156_s25, 512  ;;  %p1934_p2 = scmp.lt.s32.totalorder %s2156_s25, %s2156_s25 }
  0x1d   : > { %p1927_p9 = scmp.ne.s32.totalorder %s2156_s25, %s1926_s10  ;;  %p1935_p12 = scmp.lt.s32.totalorder %s1926_s10, %s1926_s10 }
  0x1f   : > { %p1929_p10 = pnand %p1927_p9, %p1915_p13  ;;  %p1936_p0 = por %p1935_p12, %p1934_p2 }
  0x21   : > { %p1930_p1 = pneg %p1929_p10 }
  0x23   : > { %p1937_p6 = pnand %p1936_p0, %p1930_p1 }
  0x25   : > { %1940 = shalt.err (!%p1937_p6)
}
  0x26   : > { %s2073_s11 = smov 256   ;;  %s2074_s12 = smov 16  }
  0x27   : > { %1847 = dma.hbm_to_vmem [thread:$0]  (!%p2163_p11), %s3127_s1, 512, %s2156_s25, [#allocation6], %s2073_s11, %s2073_s11, %s2074_s12  }
  0x28   : > { %s1941_s27 = scalar_lea.hbm %s3129_s3, 512 }
  0x29   : > { %p1942_p1 = scmp.ne.s32.totalorder %s3129_s3, %s1941_s27  ;;  %p1948_p10 = scmp.lt.u32.totalorder %s1941_s27, %s3129_s3 }
  0x2b   : > { %p1944_p2 = pnand %p1942_p1, %p1915_p13 }
  0x2d   : > { %p1945_p6 = pneg %p1944_p2 }
  0x2f   : > { %p1950_p3 = pnand %p1948_p10, %p1945_p6 }
  0x31   : > { %1953 = shalt.err (!%p1950_p3)
}
  0x32   : > { %s1954_s25 = scalar_lea.vmem %s2167_s28, 512  ;;  %p1962_p12 = scmp.lt.s32.totalorder %s2167_s28, %s2167_s28 }
  0x33   : > { %p1955_p5 = scmp.ne.s32.totalorder %s2167_s28, %s1954_s25  ;;  %p1963_p0 = scmp.lt.s32.totalorder %s1954_s25, %s1954_s25 }
  0x35   : > { %p1957_p7 = pnand %p1955_p5, %p1915_p13  ;;  %p1964_p1 = por %p1963_p0, %p1962_p12 }
  0x37   : > { %p1958_p9 = pneg %p1957_p7 }
  0x39   : > { %p1965_p2 = pnand %p1964_p1, %p1958_p9 }
  0x3b   : > { %1968 = shalt.err (!%p1965_p2)
}
  0x3c   : > { %1850 = dma.hbm_to_vmem [thread:$0]  (!%p2163_p11), %s3129_s3, 512, %s2167_s28, [#allocation6], %s2073_s11, %s2073_s11, %s2074_s12  }
  0x3d   : > { %s2228_s26 = sadd.s32 1, %s2069_s18   ;;  %s28_s9 = sadd.s32 1, %s2065_s17 }
  0x3e   : > { %s25_s10 = ssub.s32 %s2069_s18, %s2228_s26  ;;  %p35_p13 = scmp.ne.s32.totalorder %s2065_s17, %s2061_s16 }
  0x3f   : > { %p26_p6 = scmp.eq.s32.totalorder %s25_s10, 0  ;;  %p36_p10 = scmp.eq.s32.totalorder %s2069_s18, 0 }
  0x40   : > { %p3198_p3 = scmp.eq.s32.totalorder %s2133_s19, 1  ;;  %p1861_p7 = scmp.lt.s32.totalorder %s2069_s18, 2 }
  0x41   : > { %s2244_s14 = scalar_select %p26_p6, %s2065_s17, %s28_s9  }
  0x42   : > { %p2238_p5 = por %p3198_p3, %p35_p13  ;;  %p37_p9 = por %p36_p10, %p35_p13 }
  0x43   : > { %s183_s20 = sand.u32 1, %s2065_s17   ;;  %s1590_s28 = sshll.u32 %s2069_s18, 9 }
  0x44   : > { %s3199_s13 = scalar_select %p2238_p5, 1, 0 }
  0x45   : > { %s1575_s24 = sshll.u32 %s183_s20, 5  ;;  %s2251_s30 = scalar_lea.hbm %s3126_s0, %s1590_s28 }
  0x46   : > { %s187_s5 = scalar_lea.vmem [#allocation2], %s1575_s24  ;;  %p2255_p11 = pnand %p1861_p7, %p37_p9 }
  0x47   : > { %s194_s6 = sshll.u32 %s187_s5, 4  ;;  %s2259_s7 = scalar_lea.sflag [#allocation3], %s183_s20  ;;  %s2253_s6 = int_to_ptr.vmem [resolvable:$true] %s194_s6 }
  0x48   : > { %s1969_s8 = scalar_lea.hbm %s2251_s30, 512  ;;  %p1971_p0 = pneg %p2255_p11 }
  0x49   : > { %p1970_p12 = scmp.ne.s32.totalorder %s2251_s30, %s1969_s8  ;;  %s1974_s24 = scalar_lea.hbm %s3126_s0, 1024 }
  0x4a   : > { %p1975_p13 = scmp.lt.u32.totalorder %s2251_s30, %s3126_s0  ;;  %p1976_p6 = scmp.lt.u32.totalorder %s1974_s24, %s1969_s8 }
  0x4b   : > { %p1972_p1 = pnand %p1971_p0, %p1970_p12  ;;  %p1978_p3 = scmp.lt.u32.totalorder %s1969_s8, %s2251_s30 }
  0x4c   : > { %p1977_p10 = por %p1976_p6, %p1975_p13 }
  0x4d   : > { %p1973_p2 = pneg %p1972_p1 }
  0x4e   : > { %p1979_p7 = por %p1978_p3, %p1977_p10 }
  0x50   : > { %p1980_p9 = pnand %p1979_p7, %p1973_p2 }
  0x52   : > { %1983 = shalt.err (!%p1980_p9)
}
  0x53   : > { %s1984_s20 = scalar_lea.vmem %s2253_s6, 512  ;;  %s2075_s29 = smov [#allocation2]  }
  0x54   : > { %p1985_p12 = scmp.ne.s32.totalorder %s2253_s6, %s1984_s20  ;;  %s1989_s5 = sshll.u32 %s2075_s29, 4  ;;  %s1990_s5 = int_to_ptr.vmem [resolvable:$false] %s1989_s5 }
  0x55   : > { %s1991_s9 = scalar_lea.vmem %s1990_s5, 1024  ;;  %p1992_p4 = scmp.lt.s32.totalorder %s2253_s6, %s1990_s5 }
  0x56   : > { %p1987_p1 = pnand %p1985_p12, %p1971_p0  ;;  %p1993_p13 = scmp.lt.s32.totalorder %s1991_s9, %s1984_s20 }
  0x58   : > { %p1988_p5 = pneg %p1987_p1  ;;  %p1994_p6 = por %p1993_p13, %p1992_p4 }
  0x5a   : > { %p1995_p10 = pnand %p1994_p6, %p1988_p5 }
  0x5c   : > { %1998 = shalt.err (!%p1995_p10)
}
  0x5d   : > { %1854 = dma.hbm_to_vmem [thread:$0]  (!%p2255_p11), %s2251_s30, 512, %s2253_s6, %s2259_s7, %s2073_s11, %s2073_s11, %s2074_s12  }
  0x5e   : > { %206 = sbr.rel (%p2152_p8) target bundleno = 611 (0x263), region = 36 }
  0x65   : > { %s2293_s8 = sand.u32 1, %s2061_s16   ;;  %p3201_p4 = scmp.ne.s32.totalorder %s3194_s21, 0 }
  0x66   : > { %s1579_s10 = sshll.u32 %s2293_s8, 5  ;;  %s209_s24 = scalar_lea.sflag [#allocation3], %s2293_s8 }
  0x67   : > { %s212_s25 = scalar_lea.vmem [#allocation2], %s1579_s10 }
  0x68   : > { %2044 = dma.done.wait (%p3201_p4), %s209_s24, 512  }
  0x69   : > { %2046 = vsyncadd (%p3201_p4), %s209_s24, 4294966784  ;;  %p3202_p5 = scmp.eq.s32.totalorder %s2133_s19, 0 }
  0x6b   : > { %2048 = dma.done.wait (%p3202_p5), [#allocation6], 1024   ;;  %p3203_p8 = pmov %p3202_p5 }
  0x6c   : > { %v246_v0 = vld [vmem:[%s212_s25 + $0x8] sm:$0xff]  ;;  %v245_v1 = vld [vmem:[%s212_s25] sm:$0xff]  ;;  %s2076_s23 = smov 17   ;;  %v248_v2 = vld [vmem:[%s212_s25 + $0x18] sm:$0xff]  ;;  %s2077_s11 = smov 16   ;;  %vm471_vm0 = vcmask 130048   ;;  %v261_v37 = vlaneseq }
  0x6d   : > { %2050 = vsyncadd (%p3203_p8), [#allocation6], 4294966272  ;;  %257 = vrot.lane.b32.xlu1 %v246_v0, %s2076_s23  ;;  %253 = vrot.lane.b32.xlu0 %v245_v1, %s2076_s23  ;;  %v247_v3 = vld [vmem:[%s212_s25 + $0x10] sm:$0xff]  ;;  %s2078_s21 = smov 15   ;;  %s2079_s12 = smov 1   ;;  %v510_v4 = vand.u32 4294901760, %v246_v0 }
  0x6e   : > { %v514_v5 = vand.u32 4294901760, %v248_v2  ;;  %v512_v6 = vand.u32 4294901760, %v245_v1  ;;  %v516_v7 = vand.u32 4294901760, %v247_v3  ;;  %s2080_s30 = smov 127   ;;  %s2081_s6 = smov 113   ;;  %v456_v10 = vld [vmem:[#allocation5 + $0x8] sm:$0xff] }
  0x6f   : > { %s2082_s7 = smov 112   ;;  %v473_v11 = vsel %vm471_vm0, %v456_v10, 0  ;;  %s2083_s28 = smov 111   ;;  %v2323_v17 = vsub.f32 %v246_v0, %v510_v4  ;;  %v2347_v38 = vshrl.u32 %v261_v37, 7  ;;  %v2349_v39 = vand.u32 127, %v261_v37  ;;  %v2356_v43 = vld [vmem:[#allocation7 + $0x8] sm:$0xff] }
  0x70   : > { %v2311_v8 = vpack.c.bf16 %v514_v5, %v510_v4  ;;  %v2313_v9 = vpack.c.bf16 %v516_v7, %v512_v6  ;;  %v2316_v12 = vand.u32 4294901760, %v473_v11  ;;  %v2325_v18 = vsub.f32 %v248_v2, %v514_v5  ;;  %v2358_v44 = vld [vmem:[#allocation7] sm:$0xff]  ;;  %s244_s9 = scalar_lea.vmem [#allocation8], %s1579_s10  ;;  %s1591_s25 = sshll.u32 %s2133_s19, 9 }
  0x71   : > { %259 = vrot.lane.b32.xlu1 %v248_v2, %s2076_s23  ;;  %255 = vrot.lane.b32.xlu0 %v247_v3, %s2076_s23  ;;  %3207 = vst [vmem:[#allocation15_spill] sm:$0xff] %v2323_v17  ;;  %v2327_v19 = vsub.f32 %v245_v1, %v512_v6  ;;  %v2329_v20 = vsub.f32 %v247_v3, %v516_v7  ;;  %v709_v21 = vand.u32 4294901760, %v2323_v17  ;;  %v270_v42 = vsub.s32 0, %v2347_v38  ;;  %s1478_s24 = sshll.u32 %s244_s9, 4  ;;  %p3329_p0 = scmp.ne.s32.totalorder %s3199_s13, 0  ;;  %s3076_s24 = int_to_ptr.vmem [resolvable:$true] %s1478_s24 }
  0x72   : > { %3204 = vst [vmem:[#allocation12_spill] sm:$0xff] %v2311_v8  ;;  %3205 = vst [vmem:[#allocation13_spill] sm:$0xff] %v2313_v9  ;;  %v2319_v13 = vsub.f32 %v473_v11, %v2316_v12  ;;  %v721_v22 = vand.u32 4294901760, %v2325_v18  ;;  %vm263_vm1 = vcmp.lt.s32.totalorder %v2349_v39, 17  ;;  %v295_v59 = vsub.s32 1, %v2347_v38  ;;  %s2085_s19 = smov [#allocation8]  }
  0x73   : > { %3208 = vst [vmem:[#allocation16_spill] sm:$0xff] %v2325_v18  ;;  %3209 = vst [vmem:[#allocation17_spill] sm:$0xff] %v2327_v19  ;;  %v715_v23 = vand.u32 4294901760, %v2327_v19  ;;  %v727_v24 = vand.u32 4294901760, %v2329_v20  ;;  %v710_v25 = vsub.f32 %v2323_v17, %v709_v21  ;;  %v275_v46 = vrot.slane %v2356_v43, %v270_v42 }
  0x74   : > { %3206 = vst [vmem:[#allocation14_spill] sm:$0xff] %v2319_v13  ;;  %v580_v14 = vand.u32 4294901760, %v2319_v13  ;;  %3210 = vst [vmem:[#allocation18_spill] sm:$0xff] %v2329_v20  ;;  %v722_v26 = vsub.f32 %v2325_v18, %v721_v22  ;;  %v2337_v27 = vpack.c.bf16 %v721_v22, %v709_v21  ;;  %v271_v48 = vrot.slane %v2358_v44, %v270_v42 }
  0x75   : > { %282 = vrot.lane.b32.xlu1 %v247_v3, %s2077_s11  ;;  %280 = vrot.lane.b32.xlu0 %v245_v1, %s2077_s11  ;;  %v716_v28 = vsub.f32 %v2327_v19, %v715_v23  ;;  %v728_v29 = vsub.f32 %v2329_v20, %v727_v24  ;;  %v711_v30 = vand.u32 4294901760, %v710_v25  ;;  %v2341_v32 = vpack.c.bf16 %v727_v24, %v715_v23 }
  0x76   : > { %v581_v15 = vsub.f32 %v2319_v13, %v580_v14  ;;  %1132 = vmatprep.mubr.f32.mxu0 %v580_v14  ;;  %v723_v31 = vand.u32 4294901760, %v722_v26  ;;  %vm288_vm2 = vcmp.lt.s32.totalorder %v2349_v39, 16  ;;  %v320_v23 = vsub.s32 2, %v2347_v38 }
  0x77   : > { %3211 = vst [vmem:[#allocation19_spill] sm:$0xff] %v2341_v32  ;;  %v717_v33 = vand.u32 4294901760, %v716_v28  ;;  %v729_v34 = vand.u32 4294901760, %v728_v29  ;;  %vm313_vm3 = vcmp.lt.s32.totalorder %v2349_v39, 15  ;;  %vm338_vm4 = vcmp.lt.s32.totalorder %v2349_v39, 1 }
  0x78   : > { %v582_v16 = vand.u32 4294901760, %v581_v15  ;;  %v2343_v35 = vpack.c.bf16 %v723_v31, %v711_v30  ;;  %vm363_vm5 = vcmp.lt.s32.totalorder %v2349_v39, 127  ;;  %vm388_vm6 = vcmp.lt.s32.totalorder %v2349_v39, 113 }
  0x79   : > { %286 = vrot.lane.b32.xlu1 %v248_v2, %s2077_s11  ;;  %284 = vrot.lane.b32.xlu0 %v246_v0, %s2077_s11  ;;  %v2345_v36 = vpack.c.bf16 %v729_v34, %v717_v33  ;;  %v321_v33 = vrot.slane %v2358_v44, %v320_v23  ;;  %v325_v34 = vrot.slane %v2356_v43, %v320_v23  ;;  %vm413_vm7 = vcmp.lt.s32.totalorder %v2349_v39, 112 }
  0x7a   : > { %583 = vmatprep.mubr.f32.mxu1 %v582_v16  ;;  %vm438_vm8 = vcmp.lt.s32.totalorder %v2349_v39, 111 }
  0x7d   : > { %307 = vrot.lane.b32.xlu1 %v247_v3, %s2078_s21  ;;  %305 = vrot.lane.b32.xlu0 %v245_v1, %s2078_s21 }
  0x81   : > { %311 = vrot.lane.b32.xlu1 %v248_v2, %s2078_s21  ;;  %309 = vrot.lane.b32.xlu0 %v246_v0, %s2078_s21  ;;  %s3081_s21 = scalar_lea.hbm %s3130_s4, %s1591_s25 }
  0x85   : > { %332 = vrot.lane.b32.xlu1 %v247_v3, %s2079_s12  ;;  %330 = vrot.lane.b32.xlu0 %v245_v1, %s2079_s12 }
  0x89   : > { %336 = vrot.lane.b32.xlu1 %v248_v2, %s2079_s12  ;;  %334 = vrot.lane.b32.xlu0 %v246_v0, %s2079_s12  ;;  %s1465_s12 = scalar_lea.sflag [#allocation4], %s2293_s8 }
  0x8d   : > { %357 = vrot.lane.b32.xlu1 %v247_v3, %s2080_s30  ;;  %355 = vrot.lane.b32.xlu0 %v245_v1, %s2080_s30 }
  0x91   : > { %361 = vrot.lane.b32.xlu1 %v248_v2, %s2080_s30  ;;  %359 = vrot.lane.b32.xlu0 %v246_v0, %s2080_s30  ;;  %s1999_s30 = scalar_lea.vmem %s3076_s24, 512 }
  0x92   : > { %p2000_p11 = scmp.ne.s32.totalorder %s3076_s24, %s1999_s30 }
  0x94   : > { %p2001_p2 = pnand %p2000_p11, %p3329_p0 }
  0x95   : > { %382 = vrot.lane.b32.xlu1 %v247_v3, %s2081_s6  ;;  %380 = vrot.lane.b32.xlu0 %v245_v1, %s2081_s6 }
  0x96   : > { %p2002_p3 = pneg %p2001_p2 }
  0x99   : > { %386 = vrot.lane.b32.xlu1 %v248_v2, %s2081_s6  ;;  %384 = vrot.lane.b32.xlu0 %v246_v0, %s2081_s6  ;;  %s2003_s6 = sshll.u32 %s2085_s19, 4  ;;  %s2004_s6 = int_to_ptr.vmem [resolvable:$false] %s2003_s6 }
  0x9a   : > { %p2006_p7 = scmp.lt.s32.totalorder %s3076_s24, %s2004_s6 }
  0x9d   : > { %407 = vrot.lane.b32.xlu1 %v247_v3, %s2082_s7  ;;  %405 = vrot.lane.b32.xlu0 %v245_v1, %s2082_s7 }
  0xa1   : > { %411 = vrot.lane.b32.xlu1 %v248_v2, %s2082_s7  ;;  %409 = vrot.lane.b32.xlu0 %v246_v0, %s2082_s7  ;;  %s2005_s7 = scalar_lea.vmem %s2004_s6, 1024 }
  0xa2   : > { %p2007_p9 = scmp.lt.s32.totalorder %s2005_s7, %s1999_s30 }
  0xa4   : > { %p2008_p12 = por %p2007_p9, %p2006_p7 }
  0xa5   : > { %432 = vrot.lane.b32.xlu1 %v247_v3, %s2083_s28  ;;  %430 = vrot.lane.b32.xlu0 %v245_v1, %s2083_s28  ;;  %v300_v3 = vrot.slane %v2356_v43, %v295_v59 }
  0xa6   : > { %p2009_p1 = pnand %p2008_p12, %p2002_p3 }
  0xa9   : > { %436 = vrot.lane.b32.xlu1 %v248_v2, %s2083_s28  ;;  %434 = vrot.lane.b32.xlu0 %v246_v0, %s2083_s28  ;;  %v296_v2 = vrot.slane %v2358_v44, %v295_v59 }
  0xdf   : > { %v258_v45 = vpop.permute.xlu1 %257  ;;  %v254_v47 = vpop.permute.xlu0 %253 }
  0xe0   : > { %v264_v49 = vsel %vm263_vm1, %v254_v47, %v258_v45  ;;  %v266_v50 = vsel %vm263_vm1, %v258_v45, %v254_v47 }
  0xe1   : > { %v2363_v51 = vmul.f32 %v275_v46, %v264_v49  ;;  %v2365_v54 = vmul.f32 %v271_v48, %v266_v50 }
  0xe3   : > { %v260_v52 = vpop.permute.xlu1 %259  ;;  %v256_v53 = vpop.permute.xlu0 %255  ;;  %v478_v60 = vand.u32 4294901760, %v2363_v51  ;;  %v3148_v1 = vand.u32 4294901760, %v2365_v54 }
  0xe4   : > { %v265_v55 = vsel %vm263_vm1, %v256_v53, %v260_v52  ;;  %v267_v56 = vsel %vm263_vm1, %v260_v52, %v256_v53  ;;  %v345_v53 = vsub.s32 3, %v2347_v38 }
  0xe5   : > { %v2367_v57 = vmul.f32 %v271_v48, %v267_v56  ;;  %v2369_v58 = vmul.f32 %v275_v46, %v265_v55 }
  0xe7   : > { %v3147_v61 = vand.u32 4294901760, %v2369_v58  ;;  %v3146_v62 = vand.u32 4294901760, %v2367_v57  ;;  %v283_v63 = vpop.permute.xlu1 %282  ;;  %v281_v0 = vpop.permute.xlu0 %280 }
  0xe9   : > { %v2383_v4 = vpack.c.bf16 %v3147_v61, %v478_v60  ;;  %v2389_v5 = vpack.c.bf16 %v3146_v62, %v3148_v1 }
  0xeb   : > { %3212 = vst [vmem:[#allocation20_spill] sm:$0xff] %v2383_v4  ;;  %3213 = vst [vmem:[#allocation21_spill] sm:$0xff] %v2389_v5  ;;  %v287_v6 = vpop.permute.xlu1 %286  ;;  %1593 = vmatprep.subr.bf16.mxu1 %v2383_v4  ;;  %1701 = vmatprep.subr.bf16.mxu0 %v2383_v4  ;;  %v285_v7 = vpop.permute.xlu0 %284 }
  0xec   : > { %v290_v10 = vsel %vm288_vm2, %v283_v63, %v287_v6  ;;  %v292_v11 = vsel %vm288_vm2, %v287_v6, %v283_v63  ;;  %v289_v14 = vsel %vm288_vm2, %v281_v0, %v285_v7  ;;  %v291_v15 = vsel %vm288_vm2, %v285_v7, %v281_v0  ;;  %1595 = vmatpush1.bf16.msra.mxu1 %v2389_v5 }
  0xed   : > { %v2394_v16 = vmul.f32 %v296_v2, %v292_v11  ;;  %v2396_v21 = vmul.f32 %v300_v3, %v290_v10  ;;  %v2398_v22 = vmul.f32 %v296_v2, %v291_v15  ;;  %1703 = vmatpush1.bf16.msra.mxu0 %v2389_v5  ;;  %v2402_v24 = vmul.f32 %v300_v3, %v289_v14 }
  0xee   : > { %v346_v10 = vrot.slane %v2358_v44, %v345_v53  ;;  %v350_v11 = vrot.slane %v2356_v43, %v345_v53 }
  0xef   : > { %v3144_v25 = vand.u32 4294901760, %v2396_v21  ;;  %v3139_v26 = vand.u32 4294901760, %v2394_v16  ;;  %v3138_v28 = vand.u32 4294901760, %v2398_v22  ;;  %v308_v29 = vpop.permute.xlu1 %307  ;;  %v306_v30 = vpop.permute.xlu0 %305  ;;  %v3145_v31 = vand.u32 4294901760, %v2402_v24 }
  0xf1   : > { %v2415_v37 = vpack.c.bf16 %v3139_v26, %v3138_v28  ;;  %v2421_v42 = vpack.c.bf16 %v3144_v25, %v3145_v31 }
  0xf3   : > { %3214 = vst [vmem:[#allocation22_spill] sm:$0xff] %v2415_v37  ;;  %3215 = vst [vmem:[#allocation23_spill] sm:$0xff] %v2421_v42  ;;  %v312_v45 = vpop.permute.xlu1 %311  ;;  %v310_v46 = vpop.permute.xlu0 %309  ;;  %1597 = vmatprep.subr.bf16.mxu1 %v2421_v42  ;;  %1705 = vmatprep.subr.bf16.mxu0 %v2421_v42 }
  0xf4   : > { %v315_v47 = vsel %vm313_vm3, %v308_v29, %v312_v45  ;;  %v317_v48 = vsel %vm313_vm3, %v312_v45, %v308_v29  ;;  %v314_v49 = vsel %vm313_vm3, %v306_v30, %v310_v46  ;;  %1599 = vmatpush1.bf16.msra.mxu1 %v2415_v37  ;;  %v316_v55 = vsel %vm313_vm3, %v310_v46, %v306_v30  ;;  %v458_v30 = vld [vmem:[#allocation5 + $0x18] sm:$0xff]  ;;  %v455_v46 = vld [vmem:[#allocation5] sm:$0xff] }
  0xf5   : > { %v2431_v50 = vmul.f32 %v321_v33, %v317_v48  ;;  %v2433_v52 = vmul.f32 %v325_v34, %v315_v47  ;;  %v2439_v56 = vmul.f32 %v325_v34, %v314_v49  ;;  %1707 = vmatpush1.bf16.msra.mxu0 %v2415_v37  ;;  %v2444_v0 = vmul.f32 %v321_v33, %v316_v55 }
  0xf6   : > { %v370_v49 = vsub.s32 5, %v2347_v38 }
  0xf7   : > { %v3135_v59 = vand.u32 4294901760, %v2433_v52  ;;  %v3137_v63 = vand.u32 4294901760, %v2431_v50  ;;  %v333_v2 = vpop.permute.xlu1 %332  ;;  %v331_v3 = vpop.permute.xlu0 %330  ;;  %v3136_v6 = vand.u32 4294901760, %v2439_v56  ;;  %v3134_v7 = vand.u32 4294901760, %v2444_v0 }
  0xf9   : > { %v2455_v14 = vpack.c.bf16 %v3135_v59, %v3136_v6  ;;  %v2461_v29 = vpack.c.bf16 %v3137_v63, %v3134_v7  ;;  %v2487_v7 = vand.u32 4294901760, %v455_v46 }
  0xfb   : > { %3216 = vst [vmem:[#allocation24_spill] sm:$0xff] %v2455_v14  ;;  %v337_v15 = vpop.permute.xlu1 %336  ;;  %v335_v23 = vpop.permute.xlu0 %334  ;;  %3217 = vst [vmem:[#allocation25_spill] sm:$0xff] %v2461_v29  ;;  %1601 = vmatprep.subr.bf16.mxu1 %v2455_v14  ;;  %1709 = vmatprep.subr.bf16.mxu0 %v2455_v14  ;;  %v2509_v28 = vsub.f32 %v455_v46, %v2487_v7  ;;  %v395_v46 = vsub.s32 6, %v2347_v38 }
  0xfc   : > { %v340_v33 = vsel %vm338_vm4, %v333_v2, %v337_v15  ;;  %v342_v34 = vsel %vm338_vm4, %v337_v15, %v333_v2  ;;  %v339_v45 = vsel %vm338_vm4, %v331_v3, %v335_v23  ;;  %1603 = vmatpush1.bf16.msra.mxu1 %v2461_v29  ;;  %1711 = vmatpush1.bf16.msra.mxu0 %v2461_v29  ;;  %v476_v2 = vsel %vm471_vm0, %v458_v30, 0 }
  0xfd   : > { %v2471_v47 = vmul.f32 %v346_v10, %v342_v34  ;;  %v2473_v48 = vmul.f32 %v350_v11, %v340_v33  ;;  %v341_v53 = vsel %vm338_vm4, %v335_v23, %v331_v3  ;;  %v2480_v55 = vmul.f32 %v350_v11, %v339_v45  ;;  %3218 = vst [vmem:[#allocation26_spill] sm:$0xff] %v2487_v7  ;;  %v457_v45 = vld [vmem:[#allocation5 + $0x10] sm:$0xff] }
  0xfe   : > { %v2485_v41 = vmul.f32 %v346_v10, %v341_v53  ;;  %v371_v11 = vrot.slane %v2358_v44, %v370_v49  ;;  %v375_v23 = vrot.slane %v2356_v43, %v370_v49  ;;  %v2494_v30 = vand.u32 4294901760, %v476_v2 }
  0xff   : > { %v3141_v15 = vand.u32 4294901760, %v2473_v48  ;;  %v3142_v34 = vand.u32 4294901760, %v2471_v47  ;;  %v358_v33 = vpop.permute.xlu1 %357  ;;  %v356_v40 = vpop.permute.xlu0 %355  ;;  %v3140_v59 = vand.u32 4294901760, %v2480_v55 }
 0x100   : > { %v3143_v3 = vand.u32 4294901760, %v2485_v41  ;;  %3219 = vst [vmem:[#allocation27_spill] sm:$0xff] %v2494_v30 }
 0x101   : > { %v2500_v10 = vpack.c.bf16 %v3141_v15, %v3140_v59  ;;  %v2519_v15 = vand.u32 4294901760, %v457_v45 }
 0x102   : > { %v2506_v63 = vpack.c.bf16 %v3142_v34, %v3143_v3 }
 0x103   : > { %3220 = vst [vmem:[#allocation28_spill] sm:$0xff] %v2500_v10  ;;  %v362_v53 = vpop.permute.xlu1 %361  ;;  %v360_v6 = vpop.permute.xlu0 %359  ;;  %1605 = vmatprep.subr.bf16.mxu1 %v2500_v10  ;;  %1713 = vmatprep.subr.bf16.mxu0 %v2500_v10  ;;  %3222 = vst [vmem:[#allocation30_spill] sm:$0xff] %v2519_v15 }
 0x104   : > { %3221 = vst [vmem:[#allocation29_spill] sm:$0xff] %v2506_v63  ;;  %v365_v49 = vsel %vm363_vm5, %v358_v33, %v362_v53  ;;  %v367_v26 = vsel %vm363_vm5, %v362_v53, %v358_v33  ;;  %v364_v59 = vsel %vm363_vm5, %v356_v40, %v360_v6  ;;  %1607 = vmatpush1.bf16.msra.mxu1 %v2506_v63 }
 0x105   : > { %v2521_v34 = vmul.f32 %v371_v11, %v365_v49  ;;  %v2523_v3 = vmul.f32 %v375_v23, %v367_v26  ;;  %1715 = vmatpush1.bf16.msra.mxu0 %v2506_v63  ;;  %v2529_v33 = vsub.f32 %v476_v2, %v2494_v30  ;;  %v366_v53 = vsel %vm363_vm5, %v360_v6, %v356_v40 }
 0x106   : > { %v2533_v25 = vmul.f32 %v371_v11, %v364_v59  ;;  %1609 = vmatprep.subr.bf16.mxu1 %v2311_v8  ;;  %1717 = vmatprep.subr.bf16.mxu0 %v2311_v8  ;;  %v2539_v31 = vmul.f32 %v375_v23, %v366_v53  ;;  %v2545_v40 = vsub.f32 %v457_v45, %v2519_v15  ;;  %v3224_v45 = vand.u32 4294901760, %v2365_v54 }
 0x107   : > { %v3152_v49 = vand.u32 4294901760, %v2521_v34  ;;  %v383_v62 = vpop.permute.xlu1 %382  ;;  %v381_v61 = vpop.permute.xlu0 %380  ;;  %v396_v6 = vrot.slane %v2358_v44, %v395_v46  ;;  %v400_v11 = vrot.slane %v2356_v43, %v395_v46  ;;  %v2556_v53 = vsub.f32 %v2363_v51, %v478_v60 }
 0x108   : > { %v3151_v1 = vand.u32 4294901760, %v2533_v25  ;;  %1611 = vmatpush1.bf16.msra.mxu1 %v2313_v9  ;;  %v2561_v2 = vsub.f32 %v2365_v54, %v3224_v45  ;;  %v420_v46 = vsub.s32 7, %v2347_v38  ;;  %v3227_v23 = vand.u32 4294901760, %v2369_v58 }
 0x109   : > { %1719 = vmatpush1.bf16.msra.mxu0 %v2313_v9  ;;  %3223 = vst [vmem:[#allocation31_spill] sm:$0xff] %v2556_v53  ;;  %v3229_v51 = vand.u32 4294901760, %v2367_v57  ;;  %v3231_v9 = vand.u32 4294901760, %v2539_v31  ;;  %v3232_v19 = vand.u32 4294901760, %v2523_v3  ;;  %v3234_v38 = vand.u32 4294901760, %v2509_v28 }
 0x10a   : > { %3225 = vst [vmem:[#allocation32_spill] sm:$0xff] %v2561_v2  ;;  %v2567_v26 = vpack.c.bf16 %v3152_v49, %v3151_v1  ;;  %v2573_v59 = vsub.f32 %v2369_v58, %v3227_v23 }
 0x10b   : > { %v2578_v60 = vsub.f32 %v2367_v57, %v3229_v51  ;;  %v387_v54 = vpop.permute.xlu1 %386  ;;  %v385_v45 = vpop.permute.xlu0 %384  ;;  %v2584_v1 = vpack.c.bf16 %v3232_v19, %v3231_v9  ;;  %v2589_v49 = vsub.f32 %v2509_v28, %v3234_v38  ;;  %v3235_v38 = vand.u32 4294901760, %v2529_v33 }
 0x10c   : > { %3226 = vst [vmem:[#allocation33_spill] sm:$0xff] %v2567_v26  ;;  %3228 = vst [vmem:[#allocation34_spill] sm:$0xff] %v2573_v59  ;;  %v390_v58 = vsel %vm388_vm6, %v383_v62, %v387_v54  ;;  %v392_v57 = vsel %vm388_vm6, %v387_v54, %v383_v62  ;;  %v389_v23 = vsel %vm388_vm6, %v381_v61, %v385_v45  ;;  %v619_v62 = vand.u32 4294901760, %v2561_v2 }
 0x10d   : > { %3230 = vst [vmem:[#allocation35_spill] sm:$0xff] %v2578_v60  ;;  %3233 = vst [vmem:[#allocation36_spill] sm:$0xff] %v2584_v1  ;;  %v2598_v20 = vmul.f32 %v396_v6, %v390_v58  ;;  %v2600_v9 = vmul.f32 %v400_v11, %v392_v57  ;;  %v391_v19 = vsel %vm388_vm6, %v385_v45, %v381_v61  ;;  %1613 = vmatprep.subr.bf16.mxu1 %v2584_v1 }
 0x10e   : > { %v2608_v8 = vsub.f32 %v2529_v33, %v3235_v38  ;;  %v2611_v54 = vmul.f32 %v396_v6, %v389_v23  ;;  %v2613_v17 = vmul.f32 %v400_v11, %v391_v19  ;;  %1721 = vmatprep.subr.bf16.mxu0 %v2584_v1  ;;  %1615 = vmatpush1.bf16.msra.mxu1 %v2567_v26  ;;  %v613_v58 = vand.u32 4294901760, %v2556_v53 }
 0x10f   : > { %v631_v61 = vand.u32 4294901760, %v2578_v60  ;;  %1723 = vmatpush1.bf16.msra.mxu0 %v2567_v26  ;;  %v408_v38 = vpop.permute.xlu1 %407  ;;  %v406_v51 = vpop.permute.xlu0 %405  ;;  %v625_v6 = vand.u32 4294901760, %v2573_v59  ;;  %v3236_v19 = vand.u32 4294901760, %v2545_v40  ;;  %v421_v45 = vrot.slane %v2358_v44, %v420_v46 }
 0x110   : > { %v3163_v11 = vand.u32 4294901760, %v2613_v17  ;;  %v425_v57 = vrot.slane %v2356_v43, %v420_v46  ;;  %v2636_v18 = vsub.f32 %v2561_v2, %v619_v62  ;;  %v3237_v23 = vand.u32 4294901760, %v2600_v9 }
 0x111   : > { %v2629_v1 = vsub.f32 %v2545_v40, %v3236_v19  ;;  %v3239_v19 = vand.u32 4294901760, %v2611_v54  ;;  %v3240_v10 = vand.u32 4294901760, %v2598_v20  ;;  %v2651_v43 = vsub.f32 %v2556_v53, %v613_v58 }
 0x112   : > { %v2642_v63 = vpack.c.bf16 %v3237_v23, %v3163_v11  ;;  %v2654_v46 = vsub.f32 %v2578_v60, %v631_v61  ;;  %v3242_v26 = vand.u32 4294901760, %v2402_v24  ;;  %v2662_v11 = vsub.f32 %v2573_v59, %v625_v6 }
 0x113   : > { %v2648_v44 = vpack.c.bf16 %v3240_v10, %v3239_v19  ;;  %v412_v13 = vpop.permute.xlu1 %411  ;;  %v410_v23 = vpop.permute.xlu0 %409  ;;  %v3263_v53 = vand.u32 4294901760, %v2485_v41 }
 0x114   : > { %3238 = vst [vmem:[#allocation37_spill] sm:$0xff] %v2642_v63  ;;  %v2659_v29 = vsub.f32 %v2402_v24, %v3242_v26  ;;  %v415_v10 = vsel %vm413_vm7, %v408_v38, %v412_v13  ;;  %v417_v19 = vsel %vm413_vm7, %v412_v13, %v408_v38  ;;  %v414_v37 = vsel %vm413_vm7, %v406_v51, %v410_v23 }
 0x115   : > { %3241 = vst [vmem:[#allocation38_spill] sm:$0xff] %v2648_v44  ;;  %1617 = vmatprep.subr.bf16.mxu1 %v2642_v63  ;;  %1725 = vmatprep.subr.bf16.mxu0 %v2642_v63  ;;  %v3243_v26 = vand.u32 4294901760, %v2396_v21  ;;  %v2679_v14 = vmul.f32 %v421_v45, %v415_v10  ;;  %v2681_v30 = vmul.f32 %v425_v57, %v417_v19  ;;  %v615_v24 = vand.u32 4294901760, %v2651_v43 }
 0x116   : > { %v416_v13 = vsel %vm413_vm7, %v410_v23, %v406_v51  ;;  %1619 = vmatpush1.bf16.msra.mxu1 %v2648_v44  ;;  %v2686_v38 = vmul.f32 %v421_v45, %v414_v37  ;;  %1727 = vmatpush1.bf16.msra.mxu0 %v2648_v44  ;;  %v3245_v10 = vand.u32 4294901760, %v2394_v16  ;;  %v2708_v44 = vpack.c.bf16 %v625_v6, %v613_v58  ;;  %v1583_v58 = vld [vmem:[#allocation7 + $0x10] ss:$0 sm:$0xff]  ;;  %v1584_v6 = vld [vmem:[#allocation7 + $0x18] ss:$0 sm:$0xff] }
 0x117   : > { %v2677_v15 = vsub.f32 %v2396_v21, %v3243_v26  ;;  %v2688_v42 = vmul.f32 %v425_v57, %v416_v13  ;;  %v621_v21 = vand.u32 4294901760, %v2636_v18  ;;  %v433_v23 = vpop.permute.xlu1 %432  ;;  %v431_v37 = vpop.permute.xlu0 %430  ;;  %v3247_v57 = vand.u32 4294901760, %v2398_v22 }
 0x118   : > { %v2696_v19 = vsub.f32 %v2394_v16, %v3245_v10  ;;  %v3178_v43 = vand.u32 4294901760, %v2686_v38  ;;  %v627_v16 = vand.u32 4294901760, %v2662_v11  ;;  %v633_v10 = vand.u32 4294901760, %v2654_v46 }
 0x119   : > { %3244 = vst [vmem:[#allocation39_spill] sm:$0xff] %v2677_v15  ;;  %v2704_v13 = vsub.f32 %v2398_v22, %v3247_v57  ;;  %v3174_v18 = vand.u32 4294901760, %v2688_v42  ;;  %v2712_v51 = vpack.c.bf16 %v631_v61, %v619_v62  ;;  %v649_v26 = vand.u32 4294901760, %v2677_v15 }
 0x11a   : > { %3246 = vst [vmem:[#allocation40_spill] sm:$0xff] %v2696_v19  ;;  %v3249_v45 = vand.u32 4294901760, %v2431_v50  ;;  %v3251_v22 = vand.u32 4294901760, %v2439_v56  ;;  %v3252_v11 = vand.u32 4294901760, %v2681_v30  ;;  %v3254_v61 = vand.u32 4294901760, %v2679_v14 }
 0x11b   : > { %3248 = vst [vmem:[#allocation41_spill] sm:$0xff] %v2704_v13  ;;  %v3260_v7 = vand.u32 4294901760, %v2659_v29  ;;  %v650_v2 = vsub.f32 %v2677_v15, %v649_v26 }
 0x11c   : > { %v2718_v63 = vsub.f32 %v2431_v50, %v3249_v45  ;;  %v2723_v57 = vsub.f32 %v2439_v56, %v3251_v22  ;;  %v2729_v62 = vpack.c.bf16 %v3252_v11, %v3174_v18  ;;  %v2735_v46 = vpack.c.bf16 %v3254_v61, %v3178_v43  ;;  %v437_v11 = vpop.permute.xlu1 %436  ;;  %v435_v18 = vpop.permute.xlu0 %434 }
 0x11d   : > { %v655_v50 = vand.u32 4294901760, %v2696_v19  ;;  %v3256_v45 = vand.u32 4294901760, %v2433_v52  ;;  %v3258_v22 = vand.u32 4294901760, %v2444_v0  ;;  %v638_v60 = vsub.f32 %v2659_v29, %v3260_v7 }
 0x11e   : > { %3250 = vst [vmem:[#allocation42_spill] sm:$0xff] %v2718_v63  ;;  %3253 = vst [vmem:[#allocation43_spill] sm:$0xff] %v2729_v62  ;;  %v643_v61 = vand.u32 4294901760, %v2704_v13  ;;  %v440_v43 = vsel %vm438_vm8, %v433_v23, %v437_v11  ;;  %1621 = vmatprep.subr.bf16.mxu1 %v2729_v62  ;;  %1729 = vmatprep.subr.bf16.mxu0 %v2729_v62  ;;  %v441_v7 = vsel %vm438_vm8, %v435_v18, %v431_v37 }
 0x11f   : > { %3255 = vst [vmem:[#allocation44_spill] sm:$0xff] %v2735_v46  ;;  %v2741_v56 = vsub.f32 %v2433_v52, %v3256_v45  ;;  %v2746_v5 = vsub.f32 %v2444_v0, %v3258_v22  ;;  %v442_v52 = vsel %vm438_vm8, %v437_v11, %v433_v23  ;;  %v439_v45 = vsel %vm438_vm8, %v431_v37, %v435_v18 }
 0x120   : > { %v2760_v0 = vmul.f32 %v1583_v58, %v440_v43  ;;  %v2762_v22 = vmul.f32 %v1584_v6, %v442_v52  ;;  %1623 = vmatpush1.bf16.msra.mxu1 %v2735_v46  ;;  %v679_v23 = vand.u32 4294901760, %v2718_v63  ;;  %v2769_v11 = vmul.f32 %v1583_v58, %v439_v45  ;;  %1731 = vmatpush1.bf16.msra.mxu0 %v2735_v46 }
 0x121   : > { %3257 = vst [vmem:[#allocation45_spill] sm:$0xff] %v2741_v56  ;;  %3259 = vst [vmem:[#allocation46_spill] sm:$0xff] %v2746_v5  ;;  %v2771_v4 = vmul.f32 %v1584_v6, %v441_v7  ;;  %v661_v43 = vand.u32 4294901760, %v2723_v57  ;;  %v667_v52 = vand.u32 4294901760, %v2746_v5  ;;  %v673_v37 = vand.u32 4294901760, %v2741_v56 }
 0x122   : > { %v3261_v18 = vand.u32 4294901760, %v2473_v48  ;;  %v3262_v58 = vand.u32 4294901760, %v2480_v55  ;;  %v3188_v7 = vand.u32 4294901760, %v2769_v11  ;;  %v656_v62 = vsub.f32 %v2696_v19, %v655_v50 }
 0x123   : > { %v3189_v45 = vand.u32 4294901760, %v2771_v4  ;;  %v644_v39 = vsub.f32 %v2704_v13, %v643_v61  ;;  %v639_v46 = vand.u32 4294901760, %v638_v60  ;;  %v651_v59 = vand.u32 4294901760, %v650_v2 }
 0x124   : > { %v2782_v15 = vsub.f32 %v2473_v48, %v3261_v18  ;;  %v2787_v6 = vsub.f32 %v2480_v55, %v3262_v58  ;;  %v2796_v48 = vsub.f32 %v2485_v41, %v3263_v53  ;;  %v3264_v55 = vand.u32 4294901760, %v2762_v22 }
 0x125   : > { %v3266_v58 = vand.u32 4294901760, %v2760_v0  ;;  %v1628_v13 = vpack.c.bf16 %v627_v16, %v615_v24  ;;  %v668_v2 = vsub.f32 %v2746_v5, %v667_v52  ;;  %v3267_v60 = vand.u32 4294901760, %v2471_v47 }
 0x126   : > { %v2802_v18 = vpack.c.bf16 %v3264_v55, %v3189_v45  ;;  %v1630_v53 = vpack.c.bf16 %v633_v10, %v621_v21  ;;  %v662_v32 = vsub.f32 %v2723_v57, %v661_v43  ;;  %v680_v55 = vsub.f32 %v2718_v63, %v679_v23 }
 0x127   : > { %v2808_v19 = vpack.c.bf16 %v3266_v58, %v3188_v7  ;;  %v2814_v41 = vsub.f32 %v2471_v47, %v3267_v60  ;;  %v674_v58 = vsub.f32 %v2741_v56, %v673_v37  ;;  %v685_v24 = vand.u32 4294901760, %v2787_v6 }
 0x128   : > { %3265 = vst [vmem:[#allocation47_spill] sm:$0xff] %v2802_v18  ;;  %1625 = vmatprep.subr.bf16.mxu1 %v2802_v18  ;;  %1733 = vmatprep.subr.bf16.mxu0 %v2802_v18  ;;  %v697_v16 = vand.u32 4294901760, %v2782_v15  ;;  %v1632_v47 = vpack.c.bf16 %v651_v59, %v639_v46  ;;  %v3268_v21 = vand.u32 4294901760, %v2659_v29  ;;  %v645_v60 = vand.u32 4294901760, %v644_v39 }
 0x129   : > { %1627 = vmatpush1.bf16.msra.mxu1 %v2808_v19  ;;  %1735 = vmatpush1.bf16.msra.mxu0 %v2808_v19  ;;  %v657_v7 = vand.u32 4294901760, %v656_v62  ;;  %v691_v45 = vand.u32 4294901760, %v2796_v48  ;;  %v3269_v18 = vand.u32 4294901760, %v2523_v3  ;;  %v3270_v5 = vand.u32 4294901760, %v2539_v31 }
 0x12a   : > { %v1740_v10 = vpack.c.bf16 %v649_v26, %v3268_v21  ;;  %1629 = vmatprep.subr.bf16.mxu1 %v1628_v13  ;;  %1737 = vmatprep.subr.bf16.mxu0 %v2708_v44  ;;  %v1742_v59 = vpack.c.bf16 %v655_v50, %v643_v61  ;;  %v703_v26 = vand.u32 4294901760, %v2814_v41  ;;  %v3271_v62 = vand.u32 4294901760, %v2521_v34 }
 0x12b   : > { %v2831_v63 = vsub.f32 %v2523_v3, %v3269_v18  ;;  %v2836_v56 = vsub.f32 %v2539_v31, %v3270_v5  ;;  %v663_v39 = vand.u32 4294901760, %v662_v32  ;;  %v669_v21 = vand.u32 4294901760, %v668_v2 }
 0x12c   : > { %v2843_v46 = vsub.f32 %v2521_v34, %v3271_v62  ;;  %v3272_v3 = vand.u32 4294901760, %v2589_v49  ;;  %v3273_v18 = vand.u32 4294901760, %v2509_v28  ;;  %v675_v5 = vand.u32 4294901760, %v674_v58 }
 0x12d   : > { %v681_v31 = vand.u32 4294901760, %v680_v55  ;;  %v686_v44 = vsub.f32 %v2787_v6, %v685_v24  ;;  %v698_v13 = vsub.f32 %v2782_v15, %v697_v16  ;;  %v3274_v50 = vand.u32 4294901760, %v2533_v25 }
 0x12e   : > { %589 = vmatmul.mubr.f32.vlgmr.msra.gmra.mrb[0].mxu1 %v3272_v3  ;;  %1136 = vmatmul.mubr.f32.vlgmr.msra.gmra.mrb[0].mxu0 %v3273_v18  ;;  %v1634_v32 = vpack.c.bf16 %v657_v7, %v645_v60  ;;  %v1744_v34 = vpack.c.bf16 %v673_v37, %v661_v43  ;;  %v692_v49 = vsub.f32 %v2796_v48, %v691_v45  ;;  %v733_v55 = vand.u32 4294901760, %v2836_v56 }
 0x12f   : > { %v2854_v61 = vsub.f32 %v2533_v25, %v3274_v50  ;;  %1631 = vmatpush1.bf16.msra.mxu1 %v1630_v53  ;;  %1739 = vmatpush1.bf16.msra.mxu0 %v2712_v51  ;;  %v1746_v2 = vpack.c.bf16 %v679_v23, %v667_v52  ;;  %v745_v58 = vand.u32 4294901760, %v2831_v63  ;;  %v704_v25 = vsub.f32 %v2814_v41, %v703_v26 }
 0x130   : > { %1633 = vmatprep.subr.bf16.mxu1 %v1632_v47  ;;  %1741 = vmatprep.subr.bf16.mxu0 %v1740_v10  ;;  %v751_v53 = vand.u32 4294901760, %v2843_v46  ;;  %v3275_v51 = vand.u32 4294901760, %v2600_v9  ;;  %v3276_v37 = vand.u32 4294901760, %v2613_v17  ;;  %v3277_v23 = vand.u32 4294901760, %v2608_v8 }
 0x131   : > { %v3278_v52 = vand.u32 4294901760, %v2529_v33  ;;  %v1636_v47 = vpack.c.bf16 %v675_v5, %v663_v39  ;;  %v1638_v10 = vpack.c.bf16 %v681_v31, %v669_v21  ;;  %v687_v60 = vand.u32 4294901760, %v686_v44 }
 0x132   : > { %v2869_v43 = vsub.f32 %v2600_v9, %v3275_v51  ;;  %v2874_v7 = vsub.f32 %v2613_v17, %v3276_v37  ;;  %599 = vmatprep.mubr.f32.mxu1 %v3277_v23  ;;  %v699_v62 = vand.u32 4294901760, %v698_v13  ;;  %v3279_v3 = vand.u32 4294901760, %v2629_v1  ;;  %v460_v51 = vld [vmem:[%s3128_s2 + $0x8] sm:$0xff] }
 0x133   : > { %1144 = vmatprep.mubr.f32.mxu0 %v3278_v52  ;;  %v3280_v9 = vand.u32 4294901760, %v2545_v40  ;;  %v739_v18 = vand.u32 4294901760, %v2854_v61  ;;  %v3281_v17 = vand.u32 4294901760, %v2598_v20  ;;  %v3282_v50 = vand.u32 4294901760, %v2611_v54  ;;  %1635 = vmatpush1.bf16.msra.mxu1 %v1634_v32 }
 0x134   : > { %605 = vmatmul.mubr.f32.gmra.mrb[2].mxu1 %v3279_v3  ;;  %1743 = vmatpush1.bf16.msra.mxu0 %v1742_v59  ;;  %v1748_v1 = vpack.c.bf16 %v697_v16, %v685_v24  ;;  %v693_v21 = vand.u32 4294901760, %v692_v49  ;;  %v734_v5 = vsub.f32 %v2836_v56, %v733_v55  ;;  %v746_v31 = vsub.f32 %v2831_v63, %v745_v58 }
 0x135   : > { %1148 = vmatmul.mubr.f32.gmra.mrb[2].mxu0 %v3280_v9  ;;  %v2888_v8 = vsub.f32 %v2598_v20, %v3281_v17  ;;  %v2893_v39 = vsub.f32 %v2611_v54, %v3282_v50  ;;  %1637 = vmatprep.subr.bf16.mxu1 %v1636_v47  ;;  %v752_v20 = vsub.f32 %v2843_v46, %v751_v53  ;;  %v705_v44 = vand.u32 4294901760, %v704_v25  ;;  %v459_v25 = vld [vmem:[%s3128_s2] sm:$0xff] }
 0x136   : > { %1745 = vmatprep.subr.bf16.mxu0 %v1744_v34  ;;  %v757_v54 = vand.u32 4294901760, %v2874_v7  ;;  %v769_v13 = vand.u32 4294901760, %v2869_v43  ;;  %856 = vmatprep.mubr.f32.mxu1 %v2316_v12  ;;  %v3283_v24 = vand.u32 4294901760, %v2681_v30  ;;  %v3284_v59 = vand.u32 4294901760, %v2688_v42 }
 0x137   : > { %1327 = vmatprep.mubr.f32.mxu0 %v2316_v12  ;;  %v1640_v34 = vpack.c.bf16 %v699_v62, %v687_v60  ;;  %v2084_v49 = vmov 0   ;;  %v775_v37 = vand.u32 4294901760, %v2888_v8  ;;  %1639 = vmatpush1.bf16.msra.mxu1 %v1638_v10  ;;  %v1750_v23 = vpack.c.bf16 %v703_v26, %v691_v45 }
 0x138   : > { %v2909_v16 = vsub.f32 %v2681_v30, %v3283_v24  ;;  %v2914_v32 = vsub.f32 %v2688_v42, %v3284_v59  ;;  %1911 = vset.pattern.permute.xlu0 %v2084_v49  ;;  %1912 = vset.pattern.permute.xlu1 %v2084_v49  ;;  %v740_v30 = vsub.f32 %v2854_v61, %v739_v18  ;;  %v763_v42 = vand.u32 4294901760, %v2893_v39 }
 0x139   : > { %1747 = vmatpush1.bf16.msra.mxu0 %v1746_v2  ;;  %v3285_v52 = vand.u32 4294901760, %v2679_v14  ;;  %v3286_v60 = vand.u32 4294901760, %v2686_v38  ;;  %1641 = vmatprep.subr.bf16.mxu1 %v1640_v34  ;;  %v735_v3 = vand.u32 4294901760, %v734_v5  ;;  %v747_v10 = vand.u32 4294901760, %v746_v31 }
 0x13a   : > { %1749 = vmatprep.subr.bf16.mxu0 %v1748_v1  ;;  %v1642_v2 = vpack.c.bf16 %v705_v44, %v693_v21  ;;  %v758_v9 = vsub.f32 %v2874_v7, %v757_v54  ;;  %v770_v45 = vsub.f32 %v2869_v43, %v769_v13  ;;  %463 = vperm.xlu0 %1911, %v459_v25   ;;  %v3288_v26 = vand.u32 4294901760, %v2771_v4 }
 0x13b   : > { %v2934_v47 = vsub.f32 %v2679_v14, %v3285_v52  ;;  %v2939_v62 = vsub.f32 %v2686_v38, %v3286_v60  ;;  %468 = vperm.xlu1 %1912, %v460_v51   ;;  %v3287_v14 = vand.u32 4294901760, %v2762_v22  ;;  %v781_v50 = vand.u32 4294901760, %v2914_v32 }
 0x13c   : > { %v2955_v17 = vsub.f32 %v2771_v4, %v3288_v26  ;;  %v793_v1 = vand.u32 4294901760, %v2909_v16  ;;  %v776_v21 = vsub.f32 %v2888_v8, %v775_v37  ;;  %1643 = vmatpush1.bf16.msra.mxu1 %v1642_v2  ;;  %v1756_v5 = vpack.c.bf16 %v745_v58, %v733_v55 }
 0x13d   : > { %v2950_v38 = vsub.f32 %v2762_v22, %v3287_v14  ;;  %1751 = vmatpush1.bf16.msra.mxu0 %v1750_v23  ;;  %v741_v22 = vand.u32 4294901760, %v740_v30  ;;  %v753_v31 = vand.u32 4294901760, %v752_v20  ;;  %v764_v44 = vsub.f32 %v2893_v39, %v763_v42  ;;  %1645 = vmatprep.subr.bf16.mxu1 %v2343_v35  ;;  %v3291_v23 = vld [vmem:[#allocation19_spill] sm:$0xff] }
 0x13e   : > { %v799_v4 = vand.u32 4294901760, %v2934_v47  ;;  %v787_v24 = vand.u32 4294901760, %v2939_v62  ;;  %1753 = vmatprep.subr.bf16.mxu0 %v2337_v27  ;;  %v1648_v59 = vpack.c.bf16 %v747_v10, %v735_v3  ;;  %v3289_v34 = vand.u32 4294901760, %v2760_v0 }
 0x13f   : > { %v3290_v55 = vand.u32 4294901760, %v2769_v11  ;;  %v759_v20 = vand.u32 4294901760, %v758_v9  ;;  %v771_v25 = vand.u32 4294901760, %v770_v45  ;;  %v782_v51 = vsub.f32 %v2914_v32, %v781_v50 }
 0x140   : > { %v2972_v49 = vsub.f32 %v2760_v0, %v3289_v34  ;;  %v794_v30 = vsub.f32 %v2909_v16, %v793_v1  ;;  %v805_v35 = vand.u32 4294901760, %v2955_v17  ;;  %v817_v27 = vand.u32 4294901760, %v2950_v38  ;;  %1647 = vmatpush1.bf16.msra.mxu1 %v2345_v36 }
 0x141   : > { %v2977_v58 = vsub.f32 %v2769_v11, %v3290_v55  ;;  %1755 = vmatpush1.bf16.msra.mxu0 %v3291_v23  ;;  %v1650_v0 = vpack.c.bf16 %v753_v31, %v741_v22  ;;  %v1758_v11 = vpack.c.bf16 %v751_v53, %v739_v18  ;;  %v800_v52 = vsub.f32 %v2934_v47, %v799_v4 }
 0x142   : > { %v788_v60 = vsub.f32 %v2939_v62, %v787_v24  ;;  %1649 = vmatprep.subr.bf16.mxu1 %v1648_v59  ;;  %1757 = vmatprep.subr.bf16.mxu0 %v1756_v5  ;;  %v765_v3 = vand.u32 4294901760, %v764_v44  ;;  %v777_v10 = vand.u32 4294901760, %v776_v21  ;;  %v823_v2 = vand.u32 4294901760, %v2972_v49 }
 0x143   : > { %v811_v36 = vand.u32 4294901760, %v2977_v58  ;;  %v1652_v9 = vpack.c.bf16 %v771_v25, %v759_v20  ;;  %v1760_v45 = vpack.c.bf16 %v769_v13, %v757_v54  ;;  %v783_v14 = vand.u32 4294901760, %v782_v51 }
 0x144   : > { %v795_v53 = vand.u32 4294901760, %v794_v30  ;;  %v806_v18 = vsub.f32 %v2955_v17, %v805_v35  ;;  %v818_v26 = vsub.f32 %v2950_v38, %v817_v27  ;;  %1651 = vmatpush1.bf16.msra.mxu1 %v1650_v0  ;;  %v1654_v21 = vpack.c.bf16 %v777_v10, %v765_v3  ;;  %v3297_v3 = vld [vmem:[#allocation26_spill] sm:$0xff]  ;;  %v3299_v10 = vld [vmem:[#allocation21_spill] sm:$0xff] }
 0x145   : > { %1759 = vmatpush1.bf16.msra.mxu0 %v1758_v11  ;;  %1653 = vmatprep.subr.bf16.mxu1 %v1652_v9  ;;  %v1762_v5 = vpack.c.bf16 %v775_v37, %v763_v42  ;;  %v824_v22 = vsub.f32 %v2972_v49, %v823_v2  ;;  %v812_v31 = vsub.f32 %v2977_v58, %v811_v36  ;;  %v789_v44 = vand.u32 4294901760, %v788_v60  ;;  %v3292_v11 = vld [vmem:[#allocation31_spill] sm:$0xff]  ;;  %v3295_v60 = vld [vmem:[#allocation32_spill] sm:$0xff] }
 0x146   : > { %1761 = vmatprep.subr.bf16.mxu0 %v1760_v45  ;;  %v801_v54 = vand.u32 4294901760, %v800_v52  ;;  %v1656_v13 = vpack.c.bf16 %v795_v53, %v783_v14  ;;  %v1764_v59 = vpack.c.bf16 %v793_v1, %v781_v50  ;;  %v807_v34 = vand.u32 4294901760, %v806_v18  ;;  %v3293_v50 = vld [vmem:[#allocation34_spill] sm:$0xff]  ;;  %v3294_v52 = vld [vmem:[#allocation20_spill] sm:$0xff]  ;;  %v3303_v14 = vld [vmem:[#allocation27_spill] sm:$0xff] }
 0x147   : > { %v819_v55 = vand.u32 4294901760, %v818_v26  ;;  %v1766_v25 = vpack.c.bf16 %v799_v4, %v787_v24  ;;  %v813_v51 = vand.u32 4294901760, %v812_v31  ;;  %v825_v30 = vand.u32 4294901760, %v824_v22  ;;  %v3296_v4 = vld [vmem:[#allocation35_spill] sm:$0xff]  ;;  %v3302_v9 = vld [vmem:[#allocation40_spill] sm:$0xff]  ;;  %v3304_v53 = vld [vmem:[#allocation45_spill] sm:$0xff] }
 0x148   : > { %1655 = vmatpush1.bf16.msra.mxu1 %v1654_v21  ;;  %v1658_v20 = vpack.c.bf16 %v801_v54, %v789_v44  ;;  %v1768_v37 = vpack.c.bf16 %v817_v27, %v805_v35  ;;  %v1770_v0 = vpack.c.bf16 %v823_v2, %v811_v36  ;;  %v1664_v1 = vpack.c.bf16 %v3293_v50, %v3292_v11  ;;  %v3298_v35 = vld [vmem:[#allocation39_spill] sm:$0xff]  ;;  %v3301_v36 = vld [vmem:[#allocation41_spill] sm:$0xff]  ;;  %v3305_v26 = vld [vmem:[#allocation30_spill] sm:$0xff] }
 0x149   : > { %1763 = vmatpush1.bf16.msra.mxu0 %v1762_v5  ;;  %1657 = vmatprep.subr.bf16.mxu1 %v1656_v13  ;;  %v1660_v23 = vpack.c.bf16 %v819_v55, %v807_v34  ;;  %v1662_v42 = vpack.c.bf16 %v825_v30, %v813_v51  ;;  %v1666_v24 = vpack.c.bf16 %v3296_v4, %v3295_v60  ;;  %v3300_v2 = vld [vmem:[#allocation23_spill] sm:$0xff]  ;;  %v3307_v21 = vld [vmem:[#allocation24_spill] sm:$0xff]  ;;  %v3308_v5 = vld [vmem:[#allocation46_spill] sm:$0xff] }
 0x14a   : > { %1765 = vmatprep.subr.bf16.mxu0 %v1764_v59  ;;  %v1668_v27 = vpack.c.bf16 %v3298_v35, %v2659_v29  ;;  %v1670_v45 = vpack.c.bf16 %v3302_v9, %v3301_v36  ;;  %v1672_v18 = vpack.c.bf16 %v3304_v53, %v2723_v57  ;;  %v3306_v29 = vld [vmem:[#allocation22_spill] sm:$0xff]  ;;  %v1676_v57 = vpack.c.bf16 %v2782_v15, %v2787_v6  ;;  %v3311_v54 = vld [vmem:[#allocation25_spill] sm:$0xff]  ;;  %v3312_v13 = vld [vmem:[#allocation28_spill] sm:$0xff] }
 0x14b   : > { %v3309_v22 = vld [vmem:[#allocation42_spill] sm:$0xff]  ;;  %v1678_v59 = vpack.c.bf16 %v2814_v41, %v2796_v48  ;;  %v3313_v34 = vld [vmem:[#allocation29_spill] sm:$0xff]  ;;  %v3314_v55 = vld [vmem:[#allocation16_spill] sm:$0xff]  ;;  %v1684_v15 = vpack.c.bf16 %v2831_v63, %v2836_v56  ;;  %v1686_v41 = vpack.c.bf16 %v2843_v46, %v2854_v61  ;;  %v1690_v56 = vpack.c.bf16 %v2888_v8, %v2893_v39 }
 0x14c   : > { %1659 = vmatpush1.bf16.msra.mxu1 %v1658_v20  ;;  %v1674_v31 = vpack.c.bf16 %v3309_v22, %v3308_v5  ;;  %v3310_v44 = vld [vmem:[#allocation14_spill] sm:$0xff]  ;;  %v3315_v20 = vld [vmem:[#allocation15_spill] sm:$0xff]  ;;  %v3319_v51 = vld [vmem:[#allocation17_spill] sm:$0xff]  ;;  %v1694_v61 = vpack.c.bf16 %v2934_v47, %v2939_v62  ;;  %v1698_v39 = vpack.c.bf16 %v2972_v49, %v2977_v58 }
 0x14d   : > { %1767 = vmatpush1.bf16.msra.mxu0 %v1766_v25  ;;  %1661 = vmatprep.subr.bf16.mxu1 %v1660_v23  ;;  %v3316_v25 = vpack.c.bf16 %v3314_v55, %v3315_v20  ;;  %v3318_v6 = vld [vmem:[#allocation18_spill] sm:$0xff]  ;;  %v3321_v23 = vld [vmem:[#allocation13_spill] sm:$0xff]  ;;  %v3322_v48 = vld [vmem:[#allocation36_spill] sm:$0xff] }
 0x14e   : > { %1769 = vmatprep.subr.bf16.mxu0 %v1768_v37  ;;  %v3320_v30 = vpack.c.bf16 %v3318_v6, %v3319_v51  ;;  %v1688_v37 = vpack.c.bf16 %v2869_v43, %v2874_v7  ;;  %v3324_v63 = vld [vmem:[#allocation37_spill] sm:$0xff]  ;;  %v3325_v11 = vld [vmem:[#allocation38_spill] sm:$0xff]  ;;  %v3326_v46 = vld [vmem:[#allocation43_spill] sm:$0xff]  ;;  %v1696_v43 = vpack.c.bf16 %v2950_v38, %v2955_v17 }
 0x14f   : > { %v3327_v7 = vld [vmem:[#allocation44_spill] sm:$0xff]  ;;  %v3328_v8 = vld [vmem:[#allocation47_spill] sm:$0xff] }
 0x150   : > { %1663 = vmatpush1.bf16.msra.mxu1 %v1662_v42  ;;  %v3323_v42 = vld [vmem:[#allocation33_spill] sm:$0xff] }
 0x151   : > { %1771 = vmatpush1.bf16.msra.mxu0 %v1770_v0  ;;  %1665 = vmatprep.subr.bf16.mxu1 %v1664_v1  ;;  %v1692_v0 = vpack.c.bf16 %v2909_v16, %v2914_v32 }
 0x152   : > { %1773 = vmatprep.subr.bf16.mxu0 %v3294_v52 }
 0x153   : > { %858 = vmatmul.mubr.f32.vlgmr.msra.gmra.mrb[0].mxu1 %v3297_v3 }
 0x154   : > { %1329 = vmatmul.mubr.f32.vlgmr.msra.gmra.mrb[0].mxu0 %v3297_v3  ;;  %1667 = vmatpush1.bf16.msra.mxu1 %v1666_v24 }
 0x155   : > { %1775 = vmatpush1.bf16.msra.mxu0 %v3299_v10  ;;  %1669 = vmatprep.subr.bf16.mxu1 %v1668_v27 }
 0x156   : > { %1777 = vmatprep.subr.bf16.mxu0 %v3300_v2  ;;  %864 = vmatprep.mubr.f32.mxu1 %v3303_v14 }
 0x157   : > { %1335 = vmatprep.mubr.f32.mxu0 %v3303_v14  ;;  %866 = vmatmul.mubr.f32.gmra.mrb[2].mxu1 %v3305_v26 }
 0x158   : > { %1337 = vmatmul.mubr.f32.gmra.mrb[2].mxu0 %v3305_v26  ;;  %1671 = vmatpush1.bf16.msra.mxu1 %v1670_v45 }
 0x159   : > { %1779 = vmatpush1.bf16.msra.mxu0 %v3306_v29  ;;  %1673 = vmatprep.subr.bf16.mxu1 %v1672_v18 }
 0x15a   : > { %1781 = vmatprep.subr.bf16.mxu0 %v3307_v21  ;;  %1010 = vmatprep.mubr.f32.mxu1 %v3310_v44 }
 0x15b   : > { %1444 = vmatprep.mubr.f32.mxu0 %v2316_v12  ;;  %v3317_v12 = vld [vmem:[#allocation12_spill] sm:$0xff] }
 0x15c   : > { %1675 = vmatpush1.bf16.msra.mxu1 %v1674_v31 }
 0x15d   : > { %1783 = vmatpush1.bf16.msra.mxu0 %v3311_v54  ;;  %1677 = vmatprep.subr.bf16.mxu1 %v1676_v57 }
 0x15e   : > { %1785 = vmatprep.subr.bf16.mxu0 %v3312_v13 }
 0x160   : > { %1679 = vmatpush1.bf16.msra.mxu1 %v1678_v59 }
 0x161   : > { %1787 = vmatpush1.bf16.msra.mxu0 %v3313_v34  ;;  %1681 = vmatprep.subr.bf16.mxu1 %v3316_v25 }
 0x162   : > { %1789 = vmatprep.subr.bf16.mxu0 %v3317_v12 }
 0x164   : > { %1683 = vmatpush1.bf16.msra.mxu1 %v3320_v30 }
 0x165   : > { %1791 = vmatpush1.bf16.msra.mxu0 %v3321_v23  ;;  %1685 = vmatprep.subr.bf16.mxu1 %v1684_v15 }
 0x166   : > { %1793 = vmatprep.subr.bf16.mxu0 %v3322_v48 }
 0x168   : > { %1687 = vmatpush1.bf16.msra.mxu1 %v1686_v41 }
 0x169   : > { %1795 = vmatpush1.bf16.msra.mxu0 %v3323_v42  ;;  %1689 = vmatprep.subr.bf16.mxu1 %v1688_v37 }
 0x16a   : > { %1797 = vmatprep.subr.bf16.mxu0 %v3324_v63 }
 0x16c   : > { %1691 = vmatpush1.bf16.msra.mxu1 %v1690_v56 }
 0x16d   : > { %1799 = vmatpush1.bf16.msra.mxu0 %v3325_v11  ;;  %1693 = vmatprep.subr.bf16.mxu1 %v1692_v0 }
 0x16e   : > { %1801 = vmatprep.subr.bf16.mxu0 %v3326_v46 }
 0x170   : > { %1695 = vmatpush1.bf16.msra.mxu1 %v1694_v61 }
 0x171   : > { %1803 = vmatpush1.bf16.msra.mxu0 %v3327_v7  ;;  %1697 = vmatprep.subr.bf16.mxu1 %v1696_v43 }
 0x172   : > { %1805 = vmatprep.subr.bf16.mxu0 %v3328_v8 }
 0x174   : > { %1699 = vmatpush1.bf16.msra.mxu1 %v1698_v39 }
 0x175   : > { %1807 = vmatpush1.bf16.msra.mxu0 %v2808_v19 }
 0x177   : > { %1013 = vmatmul.mubr.f32.vlgmr.msra.gmra.mrb[0].mxu1 %v2509_v28 }
 0x178   : > { %1446 = vmatmul.mubr.f32.vlgmr.msra.gmra.mrb[0].mxu0 %v3297_v3  ;;  %1020 = vmatprep.mubr.f32.mxu1 %v2529_v33 }
 0x179   : > { %1452 = vmatprep.mubr.f32.mxu0 %v3303_v14 }
 0x17b   : > { %1023 = vmatmul.mubr.f32.gmra.mrb[2].mxu1 %v2545_v40 }
 0x17c   : > { %1454 = vmatmul.mubr.f32.gmra.mrb[2].mxu0 %v3305_v26 }
 0x1b9   : > { %v464_v16 = vpop.permute.xlu0 %463 }
 0x1ba   : > { %v469_v49 = vpop.permute.xlu1 %468 }
 0x24a   : > { %v1014_v32 = vpop.f32.mrb[0].mxu1 }
 0x24b   : > { %v1447_v47 = vpop.f32.mrb[0].mxu0  ;;  %v1808_v62 = vadd.f32 %v1014_v32, %v464_v16  ;;  %v1016_v38 = vpop.f32.mrb[1].mxu1 }
 0x24c   : > { %v1449_v19 = vpop.f32.mrb[1].mxu0  ;;  %v1810_v17 = vadd.f32 %v1016_v38, %v464_v16 }
 0x24d   : > { %v1809_v28 = vadd.f32 %v1808_v62, %v1447_v47 }
 0x24e   : > { %v1811_v33 = vadd.f32 %v1810_v17, %v1449_v19  ;;  %v1024_v58 = vpop.f32.mrb[2].mxu1 }
 0x24f   : > { %v1455_v50 = vpop.f32.mrb[2].mxu0  ;;  %1460 = vst [vmem:[%s244_s9] sm:$0xff] %v1809_v28  ;;  %v1812_v40 = vadd.f32 %v1024_v58, %v469_v49  ;;  %v1026_v1 = vpop.f32.mrb[3].mxu1 }
 0x250   : > { %v1457_v52 = vpop.f32.mrb[3].mxu0  ;;  %1461 = vst [vmem:[%s244_s9 + $0x8] sm:$0xff] %v1811_v33  ;;  %v1814_v60 = vadd.f32 %v1026_v1, %v469_v49 }
 0x251   : > { %v1813_v4 = vadd.f32 %v1812_v40, %v1455_v50 }
 0x252   : > { %v1815_v24 = vadd.f32 %v1814_v60, %v1457_v52 }
 0x253   : > { %1462 = vst [vmem:[%s244_s9 + $0x10] sm:$0xff] %v1813_v4 }
 0x254   : > { %1463 = vst [vmem:[%s244_s9 + $0x18] sm:$0xff] %v1815_v24 }
 0x255   : > { %2012 = shalt.err (!%p2009_p1)
}
 0x256   : > { %s2013_s28 = scalar_lea.hbm %s3081_s21, 512  ;;  %s2017_s29 = scalar_lea.hbm %s3130_s4, 1024 }
 0x257   : > { %p2014_p13 = scmp.ne.s32.totalorder %s3081_s21, %s2013_s28  ;;  %p2018_p4 = scmp.lt.u32.totalorder %s3081_s21, %s3130_s4 }
 0x258   : > { %p2019_p5 = scmp.lt.u32.totalorder %s2017_s29, %s2013_s28  ;;  %p2021_p11 = scmp.lt.u32.totalorder %s2013_s28, %s3081_s21 }
 0x259   : > { %p2015_p6 = pnand %p2014_p13, %p3329_p0 }
 0x25a   : > { %p2020_p8 = por %p2019_p5, %p2018_p4 }
 0x25b   : > { %p2016_p10 = pneg %p2015_p6 }
 0x25c   : > { %p2022_p2 = por %p2021_p11, %p2020_p8 }
 0x25e   : > { %p2023_p3 = pnand %p2022_p2, %p2016_p10 }
 0x260   : > { %2026 = shalt.err (!%p2023_p3)
}
 0x261   : > { %s2086_s25 = smov 256  }
 0x262   : > { %1842 = dma.vmem_to_hbm [thread:$0]  (%p3329_p0), %s3076_s24, 512, %s3081_s21, %s1465_s12, %s2086_s25, %s2086_s25, %s2077_s11  }
 0x263 PF: > { %s1493_s10 = sand.u32 1, %s2057_s15   ;;  %p3330_p7 = scmp.ne.s32.totalorder %s3195_s22, 0 }
 0x264   : > { %p3331_p9 = scmp.ge.s32.totalorder %s2069_s18, 2  ;;  %s1494_s23 = scalar_lea.sflag [#allocation4], %s1493_s10 }
 0x266   : > { %p1856_p12 = pnand %p3331_p9, %p3330_p7 }
 0x268   : > { %2052 = dma.done.wait (!%p1856_p12), %s1494_s23, 512  }
 0x269   : > { %2054 = vsyncadd (!%p1856_p12), %s1494_s23, 4294966784  ;;  %p18_p1 = scmp.ge.s32.totalorder %s2228_s26, 4   ;;  %s3332_s15 = smov %s2061_s16 }
 0x26a   : > { %s3333_s16 = smov %s2065_s17  ;;  %s3334_s17 = smov %s2244_s14 }
 0x26b   : > { %s3335_s18 = smov %s2228_s26  ;;  %20 = sbr.rel (!%p18_p1) target bundleno = 6 (0x6), region = 89 }
 0x272   :  { %1499 = vsyncpa [#allocation3], 1 }
 0x273   :  { %1501 = vsyncpa [#allocation3 + $0x1], 1 }
 0x274   :  { %1502 = vsyncpa [#allocation6], 1 }
 0x275   :  { %1503 = vsyncpa [#allocation4], 1 }
 0x276   :  { %1505 = vsyncpa [#allocation4 + $0x1], 1 }

</bundles_post_ra>
